<compile_context>
chip_gen: v7x
topology: tpu7x:2x2x1
jax: 0.10.0
libtpu: 0.0.40
codegen_flags: <defaults>
</compile_context>

<pallas_src>
import itertools

import numpy as np
import jax
import jax.numpy as jnp
from jax.experimental import pallas as pl
from jax.experimental.pallas import tpu as pltpu


_LANES = 128
_SUBLANES = 8
_CHUNK = 8                                   # rows per vreg (f32)
_CHUNKS_PER_GROUP = 8                        # static inner window -> 64-row groups
_GROUP_ROWS = _CHUNK * _CHUNKS_PER_GROUP     # 64
_MAX_TILE_ROWS = 8192                        # 8192*128*4 B = 4 MiB per plane per block


def _round_up(x, m):
    return ((x + m - 1) // m) * m


# ----------------------------------------------------------------------------
# Pallas kernel: fused Hungarian-attention + clamped BCE partial sums over one
# lane-dense (tile_rows, 128) block of (pred, gt_masked, dis).
# Writes one (8, 128) partial-sum block per grid step (full-vreg, unmasked store).
# ----------------------------------------------------------------------------
def _hung_bce_tile_kernel(p_ref, g_ref, d_ref, out_ref):
    tile_rows = p_ref.shape[0]
    n_groups = tile_rows // _GROUP_ROWS

    def group_body(gidx, acc):
        base = pl.multiple_of(gidx * _GROUP_ROWS, _GROUP_ROWS)
        # Static inner loop: 8 one-vreg chunks visible to the LLO scheduler at once
        # (ILP to hide EUP log latency) while keeping live vregs per chunk small.
        for c in range(_CHUNKS_PER_GROUP):
            r0 = pl.multiple_of(base + c * _CHUNK, _CHUNK)
            pred = p_ref[pl.ds(r0, _CHUNK), :]
            gt = g_ref[pl.ds(r0, _CHUNK), :]
            dis = d_ref[pl.ds(r0, _CHUNK), :]
            # Hungarian attention: ali = clip(dis + gt, max=1); p = ali*pred, g = ali*gt.
            ali = jnp.minimum(dis + gt, 1.0)
            p = ali * pred
            g = ali * gt
            # torch F.binary_cross_entropy with log clamped at -100.  Clamp before
            # combining so 0 * (-inf) never occurs; two logs keep exact semantics for
            # non-binary gt in [0, 1].  Accumulate -BCE = log(1-p) + g*(log p - log(1-p))
            # and negate once at the end (saves VALU work per vreg).
            log_p = jnp.maximum(jnp.log(p), -100.0)
            log_1mp = jnp.maximum(jnp.log(1.0 - p), -100.0)
            acc = acc + (log_1mp + g * (log_p - log_1mp))
        return acc

    acc0 = jnp.zeros((_CHUNK, _LANES), jnp.float32)
    acc = jax.lax.fori_loop(0, n_groups, group_body, acc0)
    out_ref[...] = -acc      # single negation on the (8,128) partial


def _choose_tiling(rows):
    """Pick (tile_rows, rows_padded, num_tiles): big tiles to amortize per-step
    overhead, >= 2 grid steps when there is more than one group (v7x megacore),
    and padding bounded by < num_tiles * _GROUP_ROWS rows."""
    rows_g = _round_up(max(rows, 1), _GROUP_ROWS)
    n_groups_total = rows_g // _GROUP_ROWS
    if n_groups_total == 1:
        tile_rows = _GROUP_ROWS
    else:
        max_groups_per_tile = _MAX_TILE_ROWS // _GROUP_ROWS
        num_tiles = max(2, -(-n_groups_total // max_groups_per_tile))
        groups_per_tile = -(-n_groups_total // num_tiles)
        tile_rows = groups_per_tile * _GROUP_ROWS
    rows_padded = _round_up(rows_g, tile_rows)
    num_tiles = rows_padded // tile_rows
    return tile_rows, rows_padded, num_tiles


def _hung_bce_sum_pallas(pred_p, gt_p, dis_p, tile_rows, num_tiles):
    """Sum of -log-clamped BCE over the lane-dense padded planes.  Elements with
    dis = gt = 0 (masked / padded) contribute exactly zero."""
    partials = pl.pallas_call(
        _hung_bce_tile_kernel,
        out_shape=jax.ShapeDtypeStruct((num_tiles * _SUBLANES, _LANES), jnp.float32),
        grid=(num_tiles,),
        in_specs=[
            pl.BlockSpec((tile_rows, _LANES), lambda i: (i, 0)),
            pl.BlockSpec((tile_rows, _LANES), lambda i: (i, 0)),
            pl.BlockSpec((tile_rows, _LANES), lambda i: (i, 0)),
        ],
        out_specs=pl.BlockSpec((_SUBLANES, _LANES), lambda i: (i, 0)),
        compiler_params=pltpu.CompilerParams(
            dimension_semantics=("parallel",),       # independent tiles -> megacore sharding
            vmem_limit_bytes=32 * 1024 * 1024,       # 3 planes x 2 bufs x 4 MiB = 24 MiB max
        ),
    )(pred_p, gt_p, dis_p)
    return jnp.sum(partials, dtype=jnp.float32)


# ----------------------------------------------------------------------------
# Host-side Hungarian (maximize assignment score), matching the reference
# hungarian() that zeroes everything outside the selected matching.
# TODO(synk): combinatorial linear-sum-assignment has no clean Pallas equivalent;
# computed on host (brute force, only valid for the small synthetic sizes here).
# ----------------------------------------------------------------------------
def hungarian_host(scores, src_ns, tgt_ns):
    scores = np.asarray(scores)
    B, N, M = scores.shape
    out = np.zeros((B, N, M), dtype=np.float32)
    for b in range(B):
        n1, n2 = int(src_ns[b]), int(tgt_ns[b])
        sub = scores[b, :n1, :n2]
        if n1 <= n2:
            best_val, best = -np.inf, None
            for cols in itertools.permutations(range(n2), n1):
                v = sub[np.arange(n1), list(cols)].sum()
                if v > best_val:
                    best_val, best = v, cols
            for i, j in enumerate(best):
                out[b, i, j] = 1.0
        else:
            best_val, best = -np.inf, None
            for rows in itertools.permutations(range(n1), n2):
                v = sub[list(rows), np.arange(n2)].sum()
                if v > best_val:
                    best_val, best = v, rows
            for j, i in enumerate(best):
                out[b, i, j] = 1.0
    return out


def permutation_loss_hung(pred_perm, gt_perm, src_ns, tgt_ns, *, validate=False):
    pred = jnp.asarray(pred_perm, jnp.float32)
    gt = jnp.asarray(gt_perm, jnp.float32)
    src = jnp.asarray(src_ns, jnp.int32)
    tgt = jnp.asarray(tgt_ns, jnp.int32)

    if validate:  # guarded: full-device reduction + host sync, keep out of the hot path
        assert bool(jnp.all((pred >= 0) & (pred <= 1)))
        assert bool(jnp.all((gt >= 0) & (gt <= 1)))

    B, N, M = pred.shape
    total = B * N * M
    rows = -(-total // _LANES)
    tile_rows, rows_padded, num_tiles = _choose_tiling(rows)
    pad_elems = rows_padded * _LANES - total

    # TODO(synk): host-side Hungarian step (see hungarian_host); synchronous device_get
    # of pred — in a real pipeline this should be overlapped / replaced.
    dis_np = hungarian_host(np.asarray(jax.device_get(pred)),
                            np.asarray(src_ns), np.asarray(tgt_ns))

    # dis is built directly in the padded lane-dense layout on host: only its H2D
    # transfer touches HBM (no device-side pass).  It is already zero outside each
    # batch's valid [src_ns[b], tgt_ns[b]] block.
    dis_flat = np.zeros((rows_padded * _LANES,), np.float32)
    dis_flat[:total] = dis_np.reshape(-1)
    dis_p = jnp.asarray(dis_flat.reshape(rows_padded, _LANES))

    # Validity mask folded into gt's single flatten/pad pass (fuses with the pad copy).
    # With gt = dis = 0 outside the valid block, ali = 0 there -> p = g = 0 -> BCE = 0,
    # so the kernel needs no mask and padded pred values are irrelevant.
    rows_i = jax.lax.broadcasted_iota(jnp.int32, (B, N, M), 1)
    cols_i = jax.lax.broadcasted_iota(jnp.int32, (B, N, M), 2)
    mask = (rows_i < src[:, None, None]) & (cols_i < tgt[:, None, None])
    gt_m = jnp.where(mask, gt, 0.0)

    pred_p = jnp.pad(pred.reshape(-1), (0, pad_elems)).reshape(rows_padded, _LANES)
    gt_p = jnp.pad(gt_m.reshape(-1), (0, pad_elems)).reshape(rows_padded, _LANES)

    loss_sum = _hung_bce_sum_pallas(pred_p, gt_p, dis_p, tile_rows, num_tiles)
    n_sum = jnp.sum(src.astype(jnp.float32))
    return loss_sum / n_sum


# ----------------------------------------------------------------------------
# Pure-numpy reference (mirrors the PyTorch forward) for correctness check.
# ----------------------------------------------------------------------------
def reference_loss(pred, gt, dis, src_ns, tgt_ns):
    pred = np.asarray(pred, np.float64)
    gt = np.asarray(gt, np.float64)
    dis = np.asarray(dis, np.float64)
    ali = np.minimum(dis + gt, 1.0)
    p = ali * pred
    g = ali * gt
    with np.errstate(divide="ignore"):
        log_p = np.maximum(np.log(p), -100.0)
        log_1mp = np.maximum(np.log(1.0 - p), -100.0)
    bce = -(g * log_p + (1.0 - g) * log_1mp)
    total, n_sum = 0.0, 0.0
    for b in range(pred.shape[0]):
        n1, n2 = int(src_ns[b]), int(tgt_ns[b])
        total += bce[b, :n1, :n2].sum()
        n_sum += n1
    return total / n_sum


if __name__ == "__main__":
    B, N, M = 2, 8, 8
    key = jax.random.PRNGKey(0)
    pred_perm = jax.random.uniform(key, (B, N, M), dtype=jnp.float32)

    src_ns = jnp.array([6, 5], dtype=jnp.int32)
    tgt_ns = jnp.array([7, 6], dtype=jnp.int32)

    # Deterministic ground-truth partial permutation inside [:src_ns[b], :tgt_ns[b]].
    gt_np = np.zeros((B, N, M), np.float32)
    for b in range(B):
        n1, n2 = int(src_ns[b]), int(tgt_ns[b])
        for i in range(n1):
            gt_np[b, i, (i + b) % n2] = 1.0
    gt_perm = jnp.asarray(gt_np)

    loss = permutation_loss_hung(pred_perm, gt_perm, src_ns, tgt_ns)
    loss = jax.block_until_ready(loss)

    dis_np = hungarian_host(np.asarray(pred_perm), np.array(src_ns), np.array(tgt_ns))
    ref = reference_loss(np.asarray(pred_perm), gt_np, dis_np,
                         np.array(src_ns), np.array(tgt_ns))
    assert abs(float(loss) - float(ref)) < 1e-4, (float(loss), float(ref))

    print("KERNEL_OK")
</pallas_src>

<mosaic_0001>
module attributes {stable_mosaic.version = 11 : i64} {
  func.func @_hung_bce_tile_kernel(%arg0: i32, %arg1: memref<64x128xf32, #tpu.memory_space<vmem>>, %arg2: memref<64x128xf32, #tpu.memory_space<vmem>>, %arg3: memref<64x128xf32, #tpu.memory_space<vmem>>, %arg4: memref<8x128xf32, #tpu.memory_space<vmem>>) attributes {dimension_semantics = [#tpu.dimension_semantics<parallel>], iteration_bounds = array<i64: 1>, scalar_prefetch = 0 : i64, scratch_operands = 0 : i64, tpu.core_type = #tpu.core_type<tc>, window_params = [{transform_indices = @transform_0, window_bounds = array<i64: 64, 128>}, {transform_indices = @transform_1, window_bounds = array<i64: 64, 128>}, {transform_indices = @transform_2, window_bounds = array<i64: 64, 128>}, {transform_indices = @transform_3, window_bounds = array<i64: 8, 128>}]} {
    %cst = arith.constant 0.000000e+00 : f32
    %0 = vector.broadcast %cst : f32 to vector<8x128xf32>
    %c0_i32 = arith.constant 0 : i32
    %c64_i32 = arith.constant 64 : i32
    %1 = arith.muli %c0_i32, %c64_i32 : i32
    %2 = tpu.assume_multiple %1, 64 : i32
    %c0_i32_0 = arith.constant 0 : i32
    %3 = arith.addi %2, %c0_i32_0 : i32
    %4 = tpu.assume_multiple %3, 8 : i32
    %5 = arith.index_cast %4 : i32 to index
    %c0 = arith.constant 0 : index
    %6 = vector.load %arg1[%5, %c0] : memref<64x128xf32, #tpu.memory_space<vmem>>, vector<8x128xf32>
    %7 = arith.index_cast %4 : i32 to index
    %c0_1 = arith.constant 0 : index
    %8 = vector.load %arg2[%7, %c0_1] : memref<64x128xf32, #tpu.memory_space<vmem>>, vector<8x128xf32>
    %9 = arith.index_cast %4 : i32 to index
    %c0_2 = arith.constant 0 : index
    %10 = vector.load %arg3[%9, %c0_2] : memref<64x128xf32, #tpu.memory_space<vmem>>, vector<8x128xf32>
    %11 = arith.addf %10, %8 : vector<8x128xf32>
    %cst_3 = arith.constant 1.000000e+00 : f32
    %12 = vector.broadcast %cst_3 : f32 to vector<8x128xf32>
    %13 = arith.minimumf %11, %12 : vector<8x128xf32>
    %14 = arith.mulf %13, %6 : vector<8x128xf32>
    %15 = arith.mulf %13, %8 : vector<8x128xf32>
    %16 = math.log %14 : vector<8x128xf32>
    %cst_4 = arith.constant -1.000000e+02 : f32
    %17 = vector.broadcast %cst_4 : f32 to vector<8x128xf32>
    %18 = arith.maximumf %16, %17 : vector<8x128xf32>
    %cst_5 = arith.constant 1.000000e+00 : f32
    %19 = vector.broadcast %cst_5 : f32 to vector<8x128xf32>
    %20 = arith.subf %19, %14 : vector<8x128xf32>
    %21 = math.log %20 : vector<8x128xf32>
    %cst_6 = arith.constant -1.000000e+02 : f32
    %22 = vector.broadcast %cst_6 : f32 to vector<8x128xf32>
    %23 = arith.maximumf %21, %22 : vector<8x128xf32>
    %24 = arith.subf %18, %23 : vector<8x128xf32>
    %25 = arith.mulf %15, %24 : vector<8x128xf32>
    %26 = arith.addf %23, %25 : vector<8x128xf32>
    %27 = arith.addf %0, %26 : vector<8x128xf32>
    %c8_i32 = arith.constant 8 : i32
    %28 = arith.addi %2, %c8_i32 : i32
    %29 = tpu.assume_multiple %28, 8 : i32
    %30 = arith.index_cast %29 : i32 to index
    %c0_7 = arith.constant 0 : index
    %31 = vector.load %arg1[%30, %c0_7] : memref<64x128xf32, #tpu.memory_space<vmem>>, vector<8x128xf32>
    %32 = arith.index_cast %29 : i32 to index
    %c0_8 = arith.constant 0 : index
    %33 = vector.load %arg2[%32, %c0_8] : memref<64x128xf32, #tpu.memory_space<vmem>>, vector<8x128xf32>
    %34 = arith.index_cast %29 : i32 to index
    %c0_9 = arith.constant 0 : index
    %35 = vector.load %arg3[%34, %c0_9] : memref<64x128xf32, #tpu.memory_space<vmem>>, vector<8x128xf32>
    %36 = arith.addf %35, %33 : vector<8x128xf32>
    %cst_10 = arith.constant 1.000000e+00 : f32
    %37 = vector.broadcast %cst_10 : f32 to vector<8x128xf32>
    %38 = arith.minimumf %36, %37 : vector<8x128xf32>
    %39 = arith.mulf %38, %31 : vector<8x128xf32>
    %40 = arith.mulf %38, %33 : vector<8x128xf32>
    %41 = math.log %39 : vector<8x128xf32>
    %cst_11 = arith.constant -1.000000e+02 : f32
    %42 = vector.broadcast %cst_11 : f32 to vector<8x128xf32>
    %43 = arith.maximumf %41, %42 : vector<8x128xf32>
    %cst_12 = arith.constant 1.000000e+00 : f32
    %44 = vector.broadcast %cst_12 : f32 to vector<8x128xf32>
    %45 = arith.subf %44, %39 : vector<8x128xf32>
    %46 = math.log %45 : vector<8x128xf32>
    %cst_13 = arith.constant -1.000000e+02 : f32
    %47 = vector.broadcast %cst_13 : f32 to vector<8x128xf32>
    %48 = arith.maximumf %46, %47 : vector<8x128xf32>
    %49 = arith.subf %43, %48 : vector<8x128xf32>
    %50 = arith.mulf %40, %49 : vector<8x128xf32>
    %51 = arith.addf %48, %50 : vector<8x128xf32>
    %52 = arith.addf %27, %51 : vector<8x128xf32>
    %c16_i32 = arith.constant 16 : i32
    %53 = arith.addi %2, %c16_i32 : i32
    %54 = tpu.assume_multiple %53, 8 : i32
    %55 = arith.index_cast %54 : i32 to index
    %c0_14 = arith.constant 0 : index
    %56 = vector.load %arg1[%55, %c0_14] : memref<64x128xf32, #tpu.memory_space<vmem>>, vector<8x128xf32>
    %57 = arith.index_cast %54 : i32 to index
    %c0_15 = arith.constant 0 : index
    %58 = vector.load %arg2[%57, %c0_15] : memref<64x128xf32, #tpu.memory_space<vmem>>, vector<8x128xf32>
    %59 = arith.index_cast %54 : i32 to index
    %c0_16 = arith.constant 0 : index
    %60 = vector.load %arg3[%59, %c0_16] : memref<64x128xf32, #tpu.memory_space<vmem>>, vector<8x128xf32>
    %61 = arith.addf %60, %58 : vector<8x128xf32>
    %cst_17 = arith.constant 1.000000e+00 : f32
    %62 = vector.broadcast %cst_17 : f32 to vector<8x128xf32>
    %63 = arith.minimumf %61, %62 : vector<8x128xf32>
    %64 = arith.mulf %63, %56 : vector<8x128xf32>
    %65 = arith.mulf %63, %58 : vector<8x128xf32>
    %66 = math.log %64 : vector<8x128xf32>
    %cst_18 = arith.constant -1.000000e+02 : f32
    %67 = vector.broadcast %cst_18 : f32 to vector<8x128xf32>
    %68 = arith.maximumf %66, %67 : vector<8x128xf32>
    %cst_19 = arith.constant 1.000000e+00 : f32
    %69 = vector.broadcast %cst_19 : f32 to vector<8x128xf32>
    %70 = arith.subf %69, %64 : vector<8x128xf32>
    %71 = math.log %70 : vector<8x128xf32>
    %cst_20 = arith.constant -1.000000e+02 : f32
    %72 = vector.broadcast %cst_20 : f32 to vector<8x128xf32>
    %73 = arith.maximumf %71, %72 : vector<8x128xf32>
    %74 = arith.subf %68, %73 : vector<8x128xf32>
    %75 = arith.mulf %65, %74 : vector<8x128xf32>
    %76 = arith.addf %73, %75 : vector<8x128xf32>
    %77 = arith.addf %52, %76 : vector<8x128xf32>
    %c24_i32 = arith.constant 24 : i32
    %78 = arith.addi %2, %c24_i32 : i32
    %79 = tpu.assume_multiple %78, 8 : i32
    %80 = arith.index_cast %79 : i32 to index
    %c0_21 = arith.constant 0 : index
    %81 = vector.load %arg1[%80, %c0_21] : memref<64x128xf32, #tpu.memory_space<vmem>>, vector<8x128xf32>
    %82 = arith.index_cast %79 : i32 to index
    %c0_22 = arith.constant 0 : index
    %83 = vector.load %arg2[%82, %c0_22] : memref<64x128xf32, #tpu.memory_space<vmem>>, vector<8x128xf32>
    %84 = arith.index_cast %79 : i32 to index
    %c0_23 = arith.constant 0 : index
    %85 = vector.load %arg3[%84, %c0_23] : memref<64x128xf32, #tpu.memory_space<vmem>>, vector<8x128xf32>
    %86 = arith.addf %85, %83 : vector<8x128xf32>
    %cst_24 = arith.constant 1.000000e+00 : f32
    %87 = vector.broadcast %cst_24 : f32 to vector<8x128xf32>
    %88 = arith.minimumf %86, %87 : vector<8x128xf32>
    %89 = arith.mulf %88, %81 : vector<8x128xf32>
    %90 = arith.mulf %88, %83 : vector<8x128xf32>
    %91 = math.log %89 : vector<8x128xf32>
    %cst_25 = arith.constant -1.000000e+02 : f32
    %92 = vector.broadcast %cst_25 : f32 to vector<8x128xf32>
    %93 = arith.maximumf %91, %92 : vector<8x128xf32>
    %cst_26 = arith.constant 1.000000e+00 : f32
    %94 = vector.broadcast %cst_26 : f32 to vector<8x128xf32>
    %95 = arith.subf %94, %89 : vector<8x128xf32>
    %96 = math.log %95 : vector<8x128xf32>
    %cst_27 = arith.constant -1.000000e+02 : f32
    %97 = vector.broadcast %cst_27 : f32 to vector<8x128xf32>
    %98 = arith.maximumf %96, %97 : vector<8x128xf32>
    %99 = arith.subf %93, %98 : vector<8x128xf32>
    %100 = arith.mulf %90, %99 : vector<8x128xf32>
    %101 = arith.addf %98, %100 : vector<8x128xf32>
    %102 = arith.addf %77, %101 : vector<8x128xf32>
    %c32_i32 = arith.constant 32 : i32
    %103 = arith.addi %2, %c32_i32 : i32
    %104 = tpu.assume_multiple %103, 8 : i32
    %105 = arith.index_cast %104 : i32 to index
    %c0_28 = arith.constant 0 : index
    %106 = vector.load %arg1[%105, %c0_28] : memref<64x128xf32, #tpu.memory_space<vmem>>, vector<8x128xf32>
    %107 = arith.index_cast %104 : i32 to index
    %c0_29 = arith.constant 0 : index
    %108 = vector.load %arg2[%107, %c0_29] : memref<64x128xf32, #tpu.memory_space<vmem>>, vector<8x128xf32>
    %109 = arith.index_cast %104 : i32 to index
    %c0_30 = arith.constant 0 : index
    %110 = vector.load %arg3[%109, %c0_30] : memref<64x128xf32, #tpu.memory_space<vmem>>, vector<8x128xf32>
    %111 = arith.addf %110, %108 : vector<8x128xf32>
    %cst_31 = arith.constant 1.000000e+00 : f32
    %112 = vector.broadcast %cst_31 : f32 to vector<8x128xf32>
    %113 = arith.minimumf %111, %112 : vector<8x128xf32>
    %114 = arith.mulf %113, %106 : vector<8x128xf32>
    %115 = arith.mulf %113, %108 : vector<8x128xf32>
    %116 = math.log %114 : vector<8x128xf32>
    %cst_32 = arith.constant -1.000000e+02 : f32
    %117 = vector.broadcast %cst_32 : f32 to vector<8x128xf32>
    %118 = arith.maximumf %116, %117 : vector<8x128xf32>
    %cst_33 = arith.constant 1.000000e+00 : f32
    %119 = vector.broadcast %cst_33 : f32 to vector<8x128xf32>
    %120 = arith.subf %119, %114 : vector<8x128xf32>
    %121 = math.log %120 : vector<8x128xf32>
    %cst_34 = arith.constant -1.000000e+02 : f32
    %122 = vector.broadcast %cst_34 : f32 to vector<8x128xf32>
    %123 = arith.maximumf %121, %122 : vector<8x128xf32>
    %124 = arith.subf %118, %123 : vector<8x128xf32>
    %125 = arith.mulf %115, %124 : vector<8x128xf32>
    %126 = arith.addf %123, %125 : vector<8x128xf32>
    %127 = arith.addf %102, %126 : vector<8x128xf32>
    %c40_i32 = arith.constant 40 : i32
    %128 = arith.addi %2, %c40_i32 : i32
    %129 = tpu.assume_multiple %128, 8 : i32
    %130 = arith.index_cast %129 : i32 to index
    %c0_35 = arith.constant 0 : index
    %131 = vector.load %arg1[%130, %c0_35] : memref<64x128xf32, #tpu.memory_space<vmem>>, vector<8x128xf32>
    %132 = arith.index_cast %129 : i32 to index
    %c0_36 = arith.constant 0 : index
    %133 = vector.load %arg2[%132, %c0_36] : memref<64x128xf32, #tpu.memory_space<vmem>>, vector<8x128xf32>
    %134 = arith.index_cast %129 : i32 to index
    %c0_37 = arith.constant 0 : index
    %135 = vector.load %arg3[%134, %c0_37] : memref<64x128xf32, #tpu.memory_space<vmem>>, vector<8x128xf32>
    %136 = arith.addf %135, %133 : vector<8x128xf32>
    %cst_38 = arith.constant 1.000000e+00 : f32
    %137 = vector.broadcast %cst_38 : f32 to vector<8x128xf32>
    %138 = arith.minimumf %136, %137 : vector<8x128xf32>
    %139 = arith.mulf %138, %131 : vector<8x128xf32>
    %140 = arith.mulf %138, %133 : vector<8x128xf32>
    %141 = math.log %139 : vector<8x128xf32>
    %cst_39 = arith.constant -1.000000e+02 : f32
    %142 = vector.broadcast %cst_39 : f32 to vector<8x128xf32>
    %143 = arith.maximumf %141, %142 : vector<8x128xf32>
    %cst_40 = arith.constant 1.000000e+00 : f32
    %144 = vector.broadcast %cst_40 : f32 to vector<8x128xf32>
    %145 = arith.subf %144, %139 : vector<8x128xf32>
    %146 = math.log %145 : vector<8x128xf32>
    %cst_41 = arith.constant -1.000000e+02 : f32
    %147 = vector.broadcast %cst_41 : f32 to vector<8x128xf32>
    %148 = arith.maximumf %146, %147 : vector<8x128xf32>
    %149 = arith.subf %143, %148 : vector<8x128xf32>
    %150 = arith.mulf %140, %149 : vector<8x128xf32>
    %151 = arith.addf %148, %150 : vector<8x128xf32>
    %152 = arith.addf %127, %151 : vector<8x128xf32>
    %c48_i32 = arith.constant 48 : i32
    %153 = arith.addi %2, %c48_i32 : i32
    %154 = tpu.assume_multiple %153, 8 : i32
    %155 = arith.index_cast %154 : i32 to index
    %c0_42 = arith.constant 0 : index
    %156 = vector.load %arg1[%155, %c0_42] : memref<64x128xf32, #tpu.memory_space<vmem>>, vector<8x128xf32>
    %157 = arith.index_cast %154 : i32 to index
    %c0_43 = arith.constant 0 : index
    %158 = vector.load %arg2[%157, %c0_43] : memref<64x128xf32, #tpu.memory_space<vmem>>, vector<8x128xf32>
    %159 = arith.index_cast %154 : i32 to index
    %c0_44 = arith.constant 0 : index
    %160 = vector.load %arg3[%159, %c0_44] : memref<64x128xf32, #tpu.memory_space<vmem>>, vector<8x128xf32>
    %161 = arith.addf %160, %158 : vector<8x128xf32>
    %cst_45 = arith.constant 1.000000e+00 : f32
    %162 = vector.broadcast %cst_45 : f32 to vector<8x128xf32>
    %163 = arith.minimumf %161, %162 : vector<8x128xf32>
    %164 = arith.mulf %163, %156 : vector<8x128xf32>
    %165 = arith.mulf %163, %158 : vector<8x128xf32>
    %166 = math.log %164 : vector<8x128xf32>
    %cst_46 = arith.constant -1.000000e+02 : f32
    %167 = vector.broadcast %cst_46 : f32 to vector<8x128xf32>
    %168 = arith.maximumf %166, %167 : vector<8x128xf32>
    %cst_47 = arith.constant 1.000000e+00 : f32
    %169 = vector.broadcast %cst_47 : f32 to vector<8x128xf32>
    %170 = arith.subf %169, %164 : vector<8x128xf32>
    %171 = math.log %170 : vector<8x128xf32>
    %cst_48 = arith.constant -1.000000e+02 : f32
    %172 = vector.broadcast %cst_48 : f32 to vector<8x128xf32>
    %173 = arith.maximumf %171, %172 : vector<8x128xf32>
    %174 = arith.subf %168, %173 : vector<8x128xf32>
    %175 = arith.mulf %165, %174 : vector<8x128xf32>
    %176 = arith.addf %173, %175 : vector<8x128xf32>
    %177 = arith.addf %152, %176 : vector<8x128xf32>
    %c56_i32 = arith.constant 56 : i32
    %178 = arith.addi %2, %c56_i32 : i32
    %179 = tpu.assume_multiple %178, 8 : i32
    %180 = arith.index_cast %179 : i32 to index
    %c0_49 = arith.constant 0 : index
    %181 = vector.load %arg1[%180, %c0_49] : memref<64x128xf32, #tpu.memory_space<vmem>>, vector<8x128xf32>
    %182 = arith.index_cast %179 : i32 to index
    %c0_50 = arith.constant 0 : index
    %183 = vector.load %arg2[%182, %c0_50] : memref<64x128xf32, #tpu.memory_space<vmem>>, vector<8x128xf32>
    %184 = arith.index_cast %179 : i32 to index
    %c0_51 = arith.constant 0 : index
    %185 = vector.load %arg3[%184, %c0_51] : memref<64x128xf32, #tpu.memory_space<vmem>>, vector<8x128xf32>
    %186 = arith.addf %185, %183 : vector<8x128xf32>
    %cst_52 = arith.constant 1.000000e+00 : f32
    %187 = vector.broadcast %cst_52 : f32 to vector<8x128xf32>
    %188 = arith.minimumf %186, %187 : vector<8x128xf32>
    %189 = arith.mulf %188, %181 : vector<8x128xf32>
    %190 = arith.mulf %188, %183 : vector<8x128xf32>
    %191 = math.log %189 : vector<8x128xf32>
    %cst_53 = arith.constant -1.000000e+02 : f32
    %192 = vector.broadcast %cst_53 : f32 to vector<8x128xf32>
    %193 = arith.maximumf %191, %192 : vector<8x128xf32>
    %cst_54 = arith.constant 1.000000e+00 : f32
    %194 = vector.broadcast %cst_54 : f32 to vector<8x128xf32>
    %195 = arith.subf %194, %189 : vector<8x128xf32>
    %196 = math.log %195 : vector<8x128xf32>
    %cst_55 = arith.constant -1.000000e+02 : f32
    %197 = vector.broadcast %cst_55 : f32 to vector<8x128xf32>
    %198 = arith.maximumf %196, %197 : vector<8x128xf32>
    %199 = arith.subf %193, %198 : vector<8x128xf32>
    %200 = arith.mulf %190, %199 : vector<8x128xf32>
    %201 = arith.addf %198, %200 : vector<8x128xf32>
    %202 = arith.addf %177, %201 : vector<8x128xf32>
    %c1_i32 = arith.constant 1 : i32
    %cst_56 = arith.constant 0.000000e+00 : f32
    %203 = vector.broadcast %cst_56 : f32 to vector<8x128xf32>
    %204 = arith.subf %203, %202 : vector<8x128xf32>
    %c0_57 = arith.constant 0 : index
    %c0_58 = arith.constant 0 : index
    %205 = vector.load %arg4[%c0_57, %c0_58] : memref<8x128xf32, #tpu.memory_space<vmem>>, vector<8x128xf32>
    tpu.vector_store %arg4[%c0_57, %c0_58], %204 {strides = array<i32>} : memref<8x128xf32, #tpu.memory_space<vmem>>, vector<8x128xf32>,
    return
  }
  func.func @transform_0(%arg0: i32) -> (i32, i32) {
    %c0_i32 = arith.constant 0 : i32
    %c0_i32_0 = arith.constant 0 : i32
    return %arg0, %c0_i32 : i32, i32
  }
  func.func @transform_1(%arg0: i32) -> (i32, i32) {
    %c0_i32 = arith.constant 0 : i32
    %c0_i32_0 = arith.constant 0 : i32
    return %arg0, %c0_i32 : i32, i32
  }
  func.func @transform_2(%arg0: i32) -> (i32, i32) {
    %c0_i32 = arith.constant 0 : i32
    %c0_i32_0 = arith.constant 0 : i32
    return %arg0, %c0_i32 : i32, i32
  }
  func.func @transform_3(%arg0: i32) -> (i32, i32) {
    %c0_i32 = arith.constant 0 : i32
    %c0_i32_0 = arith.constant 0 : i32
    return %arg0, %c0_i32 : i32, i32
  }
}

</mosaic_0001>

<bundles_post_ra>
// kernel: tpu_custom_call.1
= control target key start
LH: loop header
LB: loop body
LE: loop exit
PB: predicated region body
PF: predicated region fallthrough
CT: control target
= control target key end

     0   :  { %8 = vsyncpa [#allocation3], 0  ;;  %s577_s0 = inlined_call_operand.hbm [shape: f32[64,128], index: 0, kind: input, shape index: {}]   ;;  %s578_s1 = inlined_call_operand.hbm [shape: f32[64,128], index: 1, kind: input, shape index: {}]   ;;  %s579_s2 = inlined_call_operand.hbm [shape: f32[64,128], index: 2, kind: input, shape index: {}]   ;;  %s580_s3 = inlined_call_operand.hbm [shape: f32[8,128], index: 3, kind: output, shape index: {}]  }
   0x1   :  { %9 = vsyncpa [#allocation6], 0 }
   0x2   :  { %10 = vsyncpa [#allocation4], 0  ;;  %s399_s12 = smov [#allocation5]   ;;  %s400_s14 = smov [#allocation2]  }
   0x3   :  { %s28_s13 = sshll.u32 %s399_s12, 4  ;;  %s16_s15 = sshll.u32 %s400_s14, 4  ;;  %s29_s13 = int_to_ptr.vmem [resolvable:$true] %s28_s13  ;;  %s425_s15 = int_to_ptr.vmem [resolvable:$true] %s16_s15 }
   0x4   :  { %s305_s18 = scalar_lea.hbm %s578_s1, 1024 }
   0x5   :  { %p306_p0 = scmp.ne.s32.totalorder %s578_s1, %s305_s18  ;;  %p309_p1 = scmp.lt.u32.totalorder %s305_s18, %s578_s1 }
   0x7   :  { %p311_p2 = pnand %p309_p1, %p306_p0 }
   0x9   :  { %314 = shalt.err (!%p311_p2)
}
   0xa   :  { %s315_s23 = scalar_lea.vmem %s29_s13, 1024  ;;  %p320_p4 = scmp.lt.s32.totalorder %s29_s13, %s29_s13 }
   0xb   :  { %p316_p3 = scmp.ne.s32.totalorder %s29_s13, %s315_s23  ;;  %p321_p5 = scmp.lt.s32.totalorder %s315_s23, %s315_s23 }
   0xd   :  { %p322_p6 = por %p321_p5, %p320_p4 }
   0xf   :  { %p323_p7 = pnand %p322_p6, %p316_p3 }
  0x11   :  { %326 = shalt.err (!%p323_p7)
}
  0x12   :  { %s401_s24 = smov 128   ;;  %s402_s25 = smov 8  }
  0x13   :  { %34 = dma.hbm_to_vmem [thread:$0]  %s578_s1, 1024, %s29_s13, [#allocation6], %s401_s24, %s401_s24, %s402_s25  }
  0x14   :  { %s327_s30 = scalar_lea.hbm %s577_s0, 1024 }
  0x15   :  { %p328_p8 = scmp.ne.s32.totalorder %s577_s0, %s327_s30  ;;  %p331_p9 = scmp.lt.u32.totalorder %s327_s30, %s577_s0 }
  0x17   :  { %p333_p10 = pnand %p331_p9, %p328_p8 }
  0x19   :  { %336 = shalt.err (!%p333_p10)
}
  0x1a   :  { %s337_s8 = scalar_lea.vmem %s425_s15, 1024  ;;  %p342_p12 = scmp.lt.s32.totalorder %s425_s15, %s425_s15 }
  0x1b   :  { %p338_p11 = scmp.ne.s32.totalorder %s425_s15, %s337_s8  ;;  %p343_p13 = scmp.lt.s32.totalorder %s337_s8, %s337_s8 }
  0x1d   :  { %p344_p0 = por %p343_p13, %p342_p12 }
  0x1f   :  { %p345_p1 = pnand %p344_p0, %p338_p11 }
  0x21   :  { %348 = shalt.err (!%p345_p1)
}
  0x22   :  { %22 = dma.hbm_to_vmem [thread:$0]  %s577_s0, 1024, %s425_s15, [#allocation3], %s401_s24, %s401_s24, %s402_s25  }
  0x23   :  { %s403_s10 = smov [#allocation7]   ;;  %s349_s14 = scalar_lea.hbm %s579_s2, 1024 }
  0x24   :  { %s40_s11 = sshll.u32 %s403_s10, 4  ;;  %p350_p2 = scmp.ne.s32.totalorder %s579_s2, %s349_s14  ;;  %s41_s11 = int_to_ptr.vmem [resolvable:$true] %s40_s11 }
  0x25   :  { %p353_p3 = scmp.lt.u32.totalorder %s349_s14, %s579_s2 }
  0x27   :  { %p355_p4 = pnand %p353_p3, %p350_p2 }
  0x29   :  { %358 = shalt.err (!%p355_p4)
}
  0x2a   :  { %s359_s20 = scalar_lea.vmem %s41_s11, 1024  ;;  %p364_p6 = scmp.lt.s32.totalorder %s41_s11, %s41_s11 }
  0x2b   :  { %p360_p5 = scmp.ne.s32.totalorder %s41_s11, %s359_s20  ;;  %p365_p7 = scmp.lt.s32.totalorder %s359_s20, %s359_s20 }
  0x2d   :  { %p366_p8 = por %p365_p7, %p364_p6 }
  0x2f   :  { %p367_p9 = pnand %p366_p8, %p360_p5 }
  0x31   :  { %370 = shalt.err (!%p367_p9)
}
  0x32   :  { %46 = dma.hbm_to_vmem [thread:$0]  %s579_s2, 1024, %s41_s11, [#allocation6], %s401_s24, %s401_s24, %s402_s25  }
  0x33   :  { %393 = dma.done.wait [#allocation3], 1024  }
  0x34   :  { %394 = vsyncadd [#allocation3], 4294966272 }
  0x35   :  { %395 = dma.done.wait [#allocation6], 2048  }
  0x36   :  { %396 = vsyncadd [#allocation6], 4294965248  ;;  %v477_v0 = vld [vmem:[#allocation5] sm:$0xff]  ;;  %v482_v3 = vld [vmem:[#allocation5 + $0x8] sm:$0xff]  ;;  %s404_s2 = smov [#allocation8]  }
  0x37   :  { %v58_v1 = vld [vmem:[#allocation7] sm:$0xff]  ;;  %v80_v4 = vld [vmem:[#allocation7 + $0x8] sm:$0xff]  ;;  %v487_v7 = vld [vmem:[#allocation5 + $0x10] sm:$0xff]  ;;  %s236_s21 = sshll.u32 %s404_s2, 4  ;;  %s237_s21 = int_to_ptr.vmem [resolvable:$true] %s236_s21 }
  0x38   :  { %v480_v2 = vadd.f32 %v58_v1, %v477_v0  ;;  %v56_v5 = vld [vmem:[#allocation2] sm:$0xff]  ;;  %v485_v6 = vadd.f32 %v80_v4, %v482_v3  ;;  %v102_v8 = vld [vmem:[#allocation7 + $0x10] sm:$0xff]  ;;  %v76_v10 = vld [vmem:[#allocation2 + $0x8] sm:$0xff]  ;;  %s371_s22 = scalar_lea.vmem %s237_s21, 128  ;;  %p376_p11 = scmp.lt.s32.totalorder %s237_s21, %s237_s21 }
  0x39   :  { %v491_v11 = vadd.f32 %v102_v8, %v487_v7  ;;  %v493_v12 = vld [vmem:[#allocation5 + $0x18] sm:$0xff]  ;;  %v98_v15 = vld [vmem:[#allocation2 + $0x10] sm:$0xff]  ;;  %v499_v17 = vld [vmem:[#allocation5 + $0x20] sm:$0xff]  ;;  %p372_p10 = scmp.ne.s32.totalorder %s237_s21, %s371_s22  ;;  %p377_p12 = scmp.lt.s32.totalorder %s371_s22, %s371_s22 }
  0x3a   :  { %v60_v9 = vmin.f32 %v480_v2, 1.0  ;;  %v124_v13 = vld [vmem:[#allocation7 + $0x18] sm:$0xff]  ;;  %v82_v14 = vmin.f32 %v485_v6, 1.0  ;;  %v146_v18 = vld [vmem:[#allocation7 + $0x20] sm:$0xff]  ;;  %v507_v23 = vld [vmem:[#allocation5 + $0x28] sm:$0xff] }
  0x3b   :  { %v497_v16 = vadd.f32 %v124_v13, %v493_v12  ;;  %v104_v20 = vmin.f32 %v491_v11, 1.0  ;;  %v120_v21 = vld [vmem:[#allocation2 + $0x18] sm:$0xff]  ;;  %v505_v22 = vadd.f32 %v146_v18, %v499_v17  ;;  %v168_v24 = vld [vmem:[#allocation7 + $0x28] sm:$0xff]  ;;  %v515_v28 = vld [vmem:[#allocation5 + $0x30] sm:$0xff]  ;;  %p378_p13 = por %p377_p12, %p376_p11 }
  0x3c   :  { %v61_v19 = vmul.f32 %v60_v9, %v56_v5  ;;  %v83_v25 = vmul.f32 %v82_v14, %v76_v10  ;;  %v513_v27 = vadd.f32 %v168_v24, %v507_v23  ;;  %v190_v31 = vld [vmem:[#allocation7 + $0x30] sm:$0xff]  ;;  %v519_v32 = vld [vmem:[#allocation5 + $0x38] sm:$0xff]  ;;  %v142_v36 = vld [vmem:[#allocation2 + $0x20] sm:$0xff]  ;;  %v62_v10 = vmul.f32 %v60_v9, %v477_v0 }
  0x3d   :  { %v126_v26 = vmin.f32 %v497_v16, 1.0  ;;  %v105_v30 = vmul.f32 %v104_v20, %v98_v15  ;;  %v212_v33 = vld [vmem:[#allocation7 + $0x38] sm:$0xff]  ;;  %v164_v37 = vld [vmem:[#allocation2 + $0x28] sm:$0xff]  ;;  %v148_v39 = vmin.f32 %v505_v22, 1.0  ;;  %v526_v42 = vadd.f32 %v190_v31, %v515_v28  ;;  %v186_v46 = vld [vmem:[#allocation2 + $0x30] sm:$0xff]  ;;  %p379_p0 = pnand %p378_p13, %p372_p10 }
  0x3e   :  { %273 = vlog2.f32 %v61_v19  ;;  %v66_v29 = vsub.f32 1.0, %v61_v19  ;;  %v88_v34 = vsub.f32 1.0, %v83_v25  ;;  %v170_v40 = vmin.f32 %v513_v27, 1.0  ;;  %v208_v47 = vld [vmem:[#allocation2 + $0x38] sm:$0xff] }
  0x3f   :  { %275 = vlog2.f32 %v83_v25  ;;  %v127_v35 = vmul.f32 %v126_v26, %v120_v21  ;;  %v110_v38 = vsub.f32 1.0, %v105_v30  ;;  %v529_v43 = vadd.f32 %v212_v33, %v519_v32 }
  0x40   :  { %277 = vlog2.f32 %v66_v29  ;;  %v149_v44 = vmul.f32 %v148_v39, %v142_v36  ;;  %v171_v45 = vmul.f32 %v170_v40, %v164_v37  ;;  %v192_v48 = vmin.f32 %v526_v42, 1.0 }
  0x41   :  { %279 = vlog2.f32 %v88_v34  ;;  %v132_v41 = vsub.f32 1.0, %v127_v35  ;;  %v214_v49 = vmin.f32 %v529_v43, 1.0  ;;  %v84_v19 = vmul.f32 %v82_v14, %v482_v3 }
  0x42   :  { %281 = vlog2.f32 %v105_v30  ;;  %v154_v50 = vsub.f32 1.0, %v149_v44  ;;  %v176_v51 = vsub.f32 1.0, %v171_v45  ;;  %v193_v52 = vmul.f32 %v192_v48, %v186_v46 }
  0x43   :  { %283 = vlog2.f32 %v110_v38  ;;  %v215_v53 = vmul.f32 %v214_v49, %v208_v47  ;;  %v106_v0 = vmul.f32 %v104_v20, %v487_v7  ;;  %v128_v3 = vmul.f32 %v126_v26, %v493_v12 }
  0x44   :  { %285 = vlog2.f32 %v127_v35  ;;  %v198_v54 = vsub.f32 1.0, %v193_v52  ;;  %v150_v7 = vmul.f32 %v148_v39, %v499_v17 }
  0x45   :  { %287 = vlog2.f32 %v132_v41  ;;  %v220_v58 = vsub.f32 1.0, %v215_v53 }
  0x46   :  { %289 = vlog2.f32 %v149_v44 }
  0x47   :  { %291 = vlog2.f32 %v154_v50 }
  0x48   :  { %v274_v55 = vpop.eup %273  ;;  %293 = vlog2.f32 %v171_v45 }
  0x49   :  { %v276_v56 = vpop.eup %275  ;;  %v64_v57 = vmul.f32 0.6931472, %v274_v55  ;;  %295 = vlog2.f32 %v176_v51 }
  0x4a   :  { %v278_v59 = vpop.eup %277  ;;  %v86_v60 = vmul.f32 0.6931472, %v276_v56  ;;  %297 = vlog2.f32 %v193_v52 }
  0x4b   :  { %v280_v61 = vpop.eup %279  ;;  %v65_v62 = vmax.f32 %v64_v57, -100.0  ;;  %v68_v63 = vmul.f32 0.6931472, %v278_v59  ;;  %299 = vlog2.f32 %v198_v54 }
  0x4c   :  { %v282_v1 = vpop.eup %281  ;;  %v87_v4 = vmax.f32 %v86_v60, -100.0  ;;  %v90_v5 = vmul.f32 0.6931472, %v280_v61  ;;  %301 = vlog2.f32 %v215_v53  ;;  %v172_v53 = vmul.f32 %v170_v40, %v507_v23 }
  0x4d   :  { %v284_v8 = vpop.eup %283  ;;  %v69_v13 = vmax.f32 %v68_v63, -100.0  ;;  %v108_v15 = vmul.f32 0.6931472, %v282_v1  ;;  %303 = vlog2.f32 %v220_v58  ;;  %v194_v23 = vmul.f32 %v192_v48, %v515_v28 }
  0x4e   :  { %v286_v18 = vpop.eup %285  ;;  %v91_v21 = vmax.f32 %v90_v5, -100.0  ;;  %v112_v24 = vmul.f32 0.6931472, %v284_v8 }
  0x4f   :  { %v288_v25 = vpop.eup %287  ;;  %v70_v29 = vsub.f32 %v65_v62, %v69_v13  ;;  %v109_v30 = vmax.f32 %v108_v15, -100.0  ;;  %v130_v31 = vmul.f32 0.6931472, %v286_v18  ;;  %v216_v18 = vmul.f32 %v214_v49, %v519_v32 }
  0x50   :  { %v290_v33 = vpop.eup %289  ;;  %v92_v34 = vsub.f32 %v87_v4, %v91_v21  ;;  %v113_v2 = vmax.f32 %v112_v24, -100.0  ;;  %v134_v9 = vmul.f32 0.6931472, %v288_v25 }
  0x51   :  { %v292_v35 = vpop.eup %291  ;;  %v71_v36 = vmul.f32 %v70_v29, %v62_v10  ;;  %v131_v6 = vmax.f32 %v130_v31, -100.0  ;;  %v152_v14 = vmul.f32 0.6931472, %v290_v33 }
  0x52   :  { %v294_v37 = vpop.eup %293  ;;  %v93_v38 = vmul.f32 %v92_v34, %v84_v19  ;;  %v114_v41 = vsub.f32 %v109_v30, %v113_v2  ;;  %v135_v44 = vmax.f32 %v134_v9, -100.0  ;;  %v156_v45 = vmul.f32 0.6931472, %v292_v35 }
  0x53   :  { %v296_v46 = vpop.eup %295  ;;  %v72_v47 = vadd.f32 %v71_v36, %v69_v13  ;;  %v153_v11 = vmax.f32 %v152_v14, -100.0  ;;  %v174_v20 = vmul.f32 0.6931472, %v294_v37 }
  0x54   :  { %v298_v50 = vpop.eup %297  ;;  %v94_v51 = vadd.f32 %v93_v38, %v91_v21  ;;  %v115_v52 = vmul.f32 %v114_v41, %v106_v0  ;;  %v136_v16 = vsub.f32 %v131_v6, %v135_v44  ;;  %v157_v12 = vmax.f32 %v156_v45, -100.0 }
  0x55   :  { %v300_v26 = vpop.eup %299  ;;  %v175_v54 = vmax.f32 %v174_v20, -100.0  ;;  %v178_v55 = vmul.f32 0.6931472, %v296_v46  ;;  %v196_v56 = vmul.f32 0.6931472, %v298_v50 }
  0x56   :  { %v302_v57 = vpop.eup %301  ;;  %v95_v58 = vadd.f32 %v94_v51, %v72_v47  ;;  %v116_v59 = vadd.f32 %v115_v52, %v113_v2  ;;  %v137_v22 = vmul.f32 %v136_v16, %v128_v3  ;;  %v158_v17 = vsub.f32 %v153_v11, %v157_v12 }
  0x57   :  { %v304_v39 = vpop.eup %303  ;;  %v179_v60 = vmax.f32 %v178_v55, -100.0  ;;  %v197_v61 = vmax.f32 %v196_v56, -100.0  ;;  %v200_v62 = vmul.f32 0.6931472, %v300_v26  ;;  %v218_v63 = vmul.f32 0.6931472, %v302_v57 }
  0x58   :  { %v117_v1 = vadd.f32 %v116_v59, %v95_v58  ;;  %v138_v4 = vadd.f32 %v137_v22, %v135_v44  ;;  %v159_v5 = vmul.f32 %v158_v17, %v150_v7  ;;  %v222_v8 = vmul.f32 0.6931472, %v304_v39 }
  0x59   :  { %v180_v10 = vsub.f32 %v175_v54, %v179_v60  ;;  %v201_v27 = vmax.f32 %v200_v62, -100.0  ;;  %v219_v40 = vmax.f32 %v218_v63, -100.0 }
  0x5a   :  { %v139_v13 = vadd.f32 %v138_v4, %v117_v1  ;;  %v160_v15 = vadd.f32 %v159_v5, %v157_v12  ;;  %v223_v19 = vmax.f32 %v222_v8, -100.0 }
  0x5b   :  { %v181_v21 = vmul.f32 %v180_v10, %v172_v53  ;;  %v202_v24 = vsub.f32 %v197_v61, %v201_v27 }
  0x5c   :  { %v161_v25 = vadd.f32 %v160_v15, %v139_v13  ;;  %v224_v29 = vsub.f32 %v219_v40, %v223_v19 }
  0x5d   :  { %v182_v30 = vadd.f32 %v181_v21, %v179_v60  ;;  %v203_v31 = vmul.f32 %v202_v24, %v194_v23 }
  0x5e   :  { %v225_v33 = vmul.f32 %v224_v29, %v216_v18 }
  0x5f   :  { %v183_v34 = vadd.f32 %v182_v30, %v161_v25  ;;  %v204_v0 = vadd.f32 %v203_v31, %v201_v27 }
  0x60   :  { %v226_v42 = vadd.f32 %v225_v33, %v223_v19 }
  0x61   :  { %v205_v28 = vadd.f32 %v204_v0, %v183_v34 }
  0x63   :  { %v227_v48 = vadd.f32 %v226_v42, %v205_v28 }
  0x65   :  { %v228_v2 = vsub.f32 0.0, %v227_v48 }
  0x67   :  { %229 = vst [vmem:[#allocation8] sm:$0xff] %v228_v2 }
  0x68   :  { %382 = shalt.err (!%p379_p0)
}
  0x69   :  { %s383_s25 = scalar_lea.hbm %s580_s3, 128 }
  0x6a   :  { %p384_p1 = scmp.ne.s32.totalorder %s580_s3, %s383_s25  ;;  %p387_p2 = scmp.lt.u32.totalorder %s383_s25, %s580_s3 }
  0x6c   :  { %p389_p3 = pnand %p387_p2, %p384_p1 }
  0x6e   :  { %392 = shalt.err (!%p389_p3)
}
  0x6f   :  { %239 = dma.vmem_to_hbm [thread:$0]  %s237_s21, 128, %s580_s3, [#allocation4]  }
  0x70   :  { %397 = dma.done.wait [#allocation4], 128  }
  0x71   :  { %398 = vsyncadd [#allocation4], 4294967168 }
  0x72   :  { %243 = vsyncpa [#allocation3], 1 }
  0x73   :  { %244 = vsyncpa [#allocation6], 1 }
  0x74   :  { %245 = vsyncpa [#allocation4], 1 }

</bundles_post_ra>
